<compile_context>
chip_gen: v6e
topology: v6e:2x2x1
jax: 0.10.0
libtpu: 0.0.40
codegen_flags: <defaults>
</compile_context>

<pallas_src>
import functools
import math

import jax
import jax.numpy as jnp
import numpy as np
from jax import lax
from jax.experimental import pallas as pl
from jax.experimental.pallas import tpu as pltpu


def _mha_kernel(vl_ref,                       # scalar prefetch: (B,) int32 in SMEM
                q_ref, k_ref, v_ref,          # (1,Tq,E), (1,Sk,E), (1,Sk,E)
                wqt_ref, wkt_ref, wvt_ref,    # (E,E) = W_{q,k,v}^T (VMEM-resident)
                wot_ref,                      # (E,E) = W_o^T       (VMEM-resident)
                attn_ref,                     # out: (H, Tq, Sk)
                out_ref,                      # out: (1, Tq, E)
                *, num_heads, head_dim, scale):
    b = pl.program_id(0)

    q = q_ref[0]            # (Tq, E)
    k = k_ref[0]            # (Sk, E)
    v = v_ref[0]            # (Sk, E)

    # Full-E projections: one wide MXU pass each, done once per grid step
    # (hoisted out of the per-head work).
    qp = jnp.dot(q, wqt_ref[...], preferred_element_type=jnp.float32)   # (Tq, E)
    kp = jnp.dot(k, wkt_ref[...], preferred_element_type=jnp.float32)   # (Sk, E)
    vp = jnp.dot(v, wvt_ref[...], preferred_element_type=jnp.float32)   # (Sk, E)

    # Hoisted mask (shared by all heads): key position >= valid_len -> -1e6.
    vl = vl_ref[b]
    tq, sk = q.shape[0], k.shape[0]
    keep = lax.broadcasted_iota(jnp.int32, (tq, sk), 1) < vl

    contract_last = (((1,), (1,)), ((), ()))     # contract shared last axis, no .T

    head_outs = []
    for h in range(num_heads):                   # static unroll; H is small
        lo = h * head_dim
        qh = qp[:, lo:lo + head_dim]             # (Tq, D)
        kh = kp[:, lo:lo + head_dim]             # (Sk, D)
        vh = vp[:, lo:lo + head_dim]             # (Sk, D)

        scores = lax.dot_general(qh, kh, contract_last,
                                 preferred_element_type=jnp.float32) * scale
        scores = jnp.where(keep, scores, jnp.float32(-1e6))
        scores = scores - jnp.max(scores, axis=-1, keepdims=True)
        e = jnp.exp(scores)
        # NOTE: pl.reciprocal(..., approx=True) would move the divide to the
        # otherwise-idle EUP slot but perturbs numerics past the 1e-5
        # reference tolerance; keep the exact divide here.
        attn = e / jnp.sum(e, axis=-1, keepdims=True)

        attn_ref[h] = attn.astype(attn_ref.dtype)
        # TODO(synk): dropout (train mode), retain_grad/requires_grad hooks and
        # the sparsemax branch have no Pallas equivalent; eval-mode softmax only.
        head_outs.append(jnp.dot(attn, vh, preferred_element_type=jnp.float32))

    # Concatenate per-head outputs and do a single full-E output projection.
    concat = jnp.concatenate(head_outs, axis=-1)                          # (Tq, E)
    out_ref[0] = jnp.dot(concat, wot_ref[...],
                         preferred_element_type=jnp.float32).astype(out_ref.dtype)


def d2l_multihead_attention(queries, keys, values, valid_lens,
                            w_q, w_k, w_v, w_o, num_heads, *, block_q=None):
    """Pallas implementation of D2LMultiHeadAttention.forward (softmax path).

    queries: (B, Sq, E); keys/values: (B, Sk, E); valid_lens: (B,) int.
    Weights are PyTorch nn.Linear style, shape (out_features, in_features).
    Returns (attention_weights (B*H, Sq, Sk), output (B, Sq, E)).
    """
    B, Sq, E = queries.shape
    Sk = keys.shape[1]
    assert E % num_heads == 0
    D = E // num_heads

    # Sq tiling so large sequences fit v7x's 64 MiB VMEM; full Sq when small.
    if block_q is None:
        block_q = Sq if Sq <= 512 else 512
    if Sq % block_q != 0 or (block_q != Sq and block_q % 8 != 0):
        block_q = Sq
    nq = Sq // block_q

    # TODO(synk): only 1-D (per-batch) valid_lens is supported; the D2L
    # masked_softmax also accepts per-query 2-D valid_lens.
    valid_lens = valid_lens.astype(jnp.int32)

    # Pre-transpose the weights in the wrapper (layout plumbing, not compute)
    # so the kernel never transposes a loaded VMEM value.
    wqt, wkt, wvt, wot = w_q.T, w_k.T, w_v.T, w_o.T

    kernel = functools.partial(_mha_kernel, num_heads=num_heads, head_dim=D,
                               scale=1.0 / math.sqrt(D))

    itm = jnp.dtype(queries.dtype).itemsize
    per_step_bytes = (block_q * E + 2 * Sk * E + 4 * E * E
                      + num_heads * block_q * Sk + block_q * E) * max(itm, 4)
    # Explicit scoped-VMEM budget (double-buffering + headroom), clamped to the
    # smallest physical VMEM across generations (v7x: 64 MiB).
    vmem_limit = int(min(64 * 1024 * 1024,
                         max(32 * 1024 * 1024, 3 * per_step_bytes)))

    flops = 2 * B * (2 * Sq * E * E + 2 * nq * Sk * E * E + 2 * Sq * Sk * E)
    bytes_accessed = itm * (B * (Sq + 2 * nq * Sk) * E + 4 * E * E
                            + B * num_heads * Sq * Sk + B * Sq * E)

    attn, out = pl.pallas_call(
        kernel,
        out_shape=(
            jax.ShapeDtypeStruct((B * num_heads, Sq, Sk), jnp.float32),
            jax.ShapeDtypeStruct((B, Sq, E), queries.dtype),
        ),
        grid_spec=pltpu.PrefetchScalarGridSpec(
            num_scalar_prefetch=1,
            grid=(B, nq),
            in_specs=[
                pl.BlockSpec((1, block_q, E), lambda b, qi, vl: (b, qi, 0)),
                pl.BlockSpec((1, Sk, E),      lambda b, qi, vl: (b, 0, 0)),
                pl.BlockSpec((1, Sk, E),      lambda b, qi, vl: (b, 0, 0)),
                pl.BlockSpec((E, E),          lambda b, qi, vl: (0, 0)),  # W_q^T
                pl.BlockSpec((E, E),          lambda b, qi, vl: (0, 0)),  # W_k^T
                pl.BlockSpec((E, E),          lambda b, qi, vl: (0, 0)),  # W_v^T
                pl.BlockSpec((E, E),          lambda b, qi, vl: (0, 0)),  # W_o^T
            ],
            out_specs=[
                pl.BlockSpec((num_heads, block_q, Sk),
                             lambda b, qi, vl: (b, qi, 0)),
                pl.BlockSpec((1, block_q, E), lambda b, qi, vl: (b, qi, 0)),
            ],
        ),
        compiler_params=pltpu.CompilerParams(
            dimension_semantics=("parallel", "parallel"),
            vmem_limit_bytes=vmem_limit),
        cost_estimate=pl.CostEstimate(
            flops=flops,
            transcendentals=B * num_heads * Sq * Sk,
            bytes_accessed=bytes_accessed),
    )(valid_lens, queries, keys, values, wqt, wkt, wvt, wot)
    return attn, out


def _reference_forward(q, k, v, valid_lens, w_q, w_k, w_v, w_o, num_heads):
    """Pure-JAX reference mirroring the PyTorch module (eval mode, softmax)."""
    B, Sq, E = q.shape
    Sk = k.shape[1]
    D = E // num_heads

    def proj_split(x, w):
        y = x @ w.T
        y = y.reshape(B, -1, num_heads, D).transpose(0, 2, 1, 3)
        return y.reshape(B * num_heads, -1, D)

    Q, K, V = proj_split(q, w_q), proj_split(k, w_k), proj_split(v, w_v)
    scores = jnp.einsum("bqd,bkd->bqk", Q, K) / math.sqrt(D)
    vl = jnp.repeat(valid_lens, num_heads)
    mask = jnp.arange(Sk)[None, None, :] < vl[:, None, None]
    scores = jnp.where(mask, scores, -1e6)
    attn = jax.nn.softmax(scores, axis=-1)
    out = attn @ V
    out = out.reshape(B, num_heads, Sq, D).transpose(0, 2, 1, 3).reshape(B, Sq, E)
    return attn, out @ w_o.T


if __name__ == "__main__":
    B, S, E, H = 2, 8, 32, 4   # batch, seq, embed_dim, num_heads

    key = jax.random.PRNGKey(0)
    kq, kk, kv, kwq, kwk, kwv, kwo = jax.random.split(key, 7)

    queries = jax.random.normal(kq, (B, S, E), dtype=jnp.float32)
    keys = jax.random.normal(kk, (B, S, E), dtype=jnp.float32)
    values = jax.random.normal(kv, (B, S, E), dtype=jnp.float32)
    valid_lens = jnp.array([5, 8], dtype=jnp.int32)

    # nn.Linear(E, E, bias=False) weights, shape (out_features, in_features).
    scale = 1.0 / math.sqrt(E)
    w_q = jax.random.uniform(kwq, (E, E), jnp.float32, -scale, scale)
    w_k = jax.random.uniform(kwk, (E, E), jnp.float32, -scale, scale)
    w_v = jax.random.uniform(kwv, (E, E), jnp.float32, -scale, scale)
    w_o = jax.random.uniform(kwo, (E, E), jnp.float32, -scale, scale)

    attn, out = d2l_multihead_attention(queries, keys, values, valid_lens,
                                        w_q, w_k, w_v, w_o, H)
    jax.block_until_ready((attn, out))

    attn_ref, out_ref = _reference_forward(queries, keys, values, valid_lens,
                                           w_q, w_k, w_v, w_o, H)
    np.testing.assert_allclose(np.asarray(attn), np.asarray(attn_ref),
                               rtol=1e-5, atol=1e-5)
    np.testing.assert_allclose(np.asarray(out), np.asarray(out_ref),
                               rtol=1e-5, atol=1e-5)
    print("KERNEL_OK")
</pallas_src>

<mosaic_0001>
module attributes {stable_mosaic.version = 11 : i64} {
  func.func @_mha_kernel(%arg0: i32, %arg1: i32, %arg2: memref<2xi32, #tpu.memory_space<smem>>, %arg3: memref<1x8x32xf32, #tpu.memory_space<vmem>>, %arg4: memref<1x8x32xf32, #tpu.memory_space<vmem>>, %arg5: memref<1x8x32xf32, #tpu.memory_space<vmem>>, %arg6: memref<32x32xf32, #tpu.memory_space<vmem>>, %arg7: memref<32x32xf32, #tpu.memory_space<vmem>>, %arg8: memref<32x32xf32, #tpu.memory_space<vmem>>, %arg9: memref<32x32xf32, #tpu.memory_space<vmem>>, %arg10: memref<4x8x8xf32, #tpu.memory_space<vmem>>, %arg11: memref<1x8x32xf32, #tpu.memory_space<vmem>>) attributes {dimension_semantics = [#tpu.dimension_semantics<parallel>, #tpu.dimension_semantics<parallel>], iteration_bounds = array<i64: 2, 1>, scalar_prefetch = 1 : i64, scratch_operands = 0 : i64, tpu.core_type = #tpu.core_type<tc>, window_params = [{transform_indices = @transform_0, window_bounds = array<i64: 1, 8, 32>}, {transform_indices = @transform_1, window_bounds = array<i64: 1, 8, 32>}, {transform_indices = @transform_2, window_bounds = array<i64: 1, 8, 32>}, {pipeline_mode = #tpu.pipeline_mode<synchronous>, transform_indices = @transform_3, window_bounds = array<i64: 32, 32>}, {pipeline_mode = #tpu.pipeline_mode<synchronous>, transform_indices = @transform_4, window_bounds = array<i64: 32, 32>}, {pipeline_mode = #tpu.pipeline_mode<synchronous>, transform_indices = @transform_5, window_bounds = array<i64: 32, 32>}, {pipeline_mode = #tpu.pipeline_mode<synchronous>, transform_indices = @transform_6, window_bounds = array<i64: 32, 32>}, {transform_indices = @transform_7, window_bounds = array<i64: 4, 8, 8>}, {transform_indices = @transform_8, window_bounds = array<i64: 1, 8, 32>}]} {
    %c0 = arith.constant 0 : index
    %c0_0 = arith.constant 0 : index
    %c0_1 = arith.constant 0 : index
    %0 = vector.load %arg3[%c0, %c0_0, %c0_1] : memref<1x8x32xf32, #tpu.memory_space<vmem>>, vector<1x8x32xf32>
    %1 = vector.shape_cast %0 : vector<1x8x32xf32> to vector<8x32xf32>
    %c0_2 = arith.constant 0 : index
    %c0_3 = arith.constant 0 : index
    %c0_4 = arith.constant 0 : index
    %2 = vector.load %arg4[%c0_2, %c0_3, %c0_4] : memref<1x8x32xf32, #tpu.memory_space<vmem>>, vector<1x8x32xf32>
    %3 = vector.shape_cast %2 : vector<1x8x32xf32> to vector<8x32xf32>
    %c0_5 = arith.constant 0 : index
    %c0_6 = arith.constant 0 : index
    %c0_7 = arith.constant 0 : index
    %4 = vector.load %arg5[%c0_5, %c0_6, %c0_7] : memref<1x8x32xf32, #tpu.memory_space<vmem>>, vector<1x8x32xf32>
    %5 = vector.shape_cast %4 : vector<1x8x32xf32> to vector<8x32xf32>
    %c0_8 = arith.constant 0 : index
    %c0_9 = arith.constant 0 : index
    %6 = vector.load %arg6[%c0_8, %c0_9] : memref<32x32xf32, #tpu.memory_space<vmem>>, vector<32x32xf32>
    %cst = arith.constant dense<0.000000e+00> : vector<8x32xf32>
    %7 = tpu.matmul %1, %6, %cst {dimension_numbers = #tpu.dot_dimension_numbers<[1], [0], [0], [1], [0, 0, 1, 1], [], []>} : vector<8x32xf32>, vector<32x32xf32>, vector<8x32xf32> -> vector<8x32xf32>
    %c0_10 = arith.constant 0 : index
    %c0_11 = arith.constant 0 : index
    %8 = vector.load %arg7[%c0_10, %c0_11] : memref<32x32xf32, #tpu.memory_space<vmem>>, vector<32x32xf32>
    %cst_12 = arith.constant dense<0.000000e+00> : vector<8x32xf32>
    %9 = tpu.matmul %3, %8, %cst_12 {dimension_numbers = #tpu.dot_dimension_numbers<[1], [0], [0], [1], [0, 0, 1, 1], [], []>} : vector<8x32xf32>, vector<32x32xf32>, vector<8x32xf32> -> vector<8x32xf32>
    %c0_13 = arith.constant 0 : index
    %c0_14 = arith.constant 0 : index
    %10 = vector.load %arg8[%c0_13, %c0_14] : memref<32x32xf32, #tpu.memory_space<vmem>>, vector<32x32xf32>
    %cst_15 = arith.constant dense<0.000000e+00> : vector<8x32xf32>
    %11 = tpu.matmul %5, %10, %cst_15 {dimension_numbers = #tpu.dot_dimension_numbers<[1], [0], [0], [1], [0, 0, 1, 1], [], []>} : vector<8x32xf32>, vector<32x32xf32>, vector<8x32xf32> -> vector<8x32xf32>
    %12 = arith.index_cast %arg0 : i32 to index
    %13 = memref.load %arg2[%12] : memref<2xi32, #tpu.memory_space<smem>>
    %14 = tpu.iota {dimensions = array<i32: 1>} : vector<8x8xi32>
    %15 = vector.broadcast %13 : i32 to vector<8x8xi32>
    %16 = arith.cmpi slt, %14, %15 : vector<8x8xi32>
    %17 = vector.extract_strided_slice %7 {offsets = [0, 0], sizes = [8, 8], strides = [1, 1]} : vector<8x32xf32> to vector<8x8xf32>
    %18 = vector.extract_strided_slice %9 {offsets = [0, 0], sizes = [8, 8], strides = [1, 1]} : vector<8x32xf32> to vector<8x8xf32>
    %19 = vector.extract_strided_slice %11 {offsets = [0, 0], sizes = [8, 8], strides = [1, 1]} : vector<8x32xf32> to vector<8x8xf32>
    %cst_16 = arith.constant dense<0.000000e+00> : vector<8x8xf32>
    %20 = tpu.matmul %17, %18, %cst_16 {dimension_numbers = #tpu.dot_dimension_numbers<[1], [1], [0], [0], [0, 0, 1, 0], [], []>} : vector<8x8xf32>, vector<8x8xf32>, vector<8x8xf32> -> vector<8x8xf32>
    %cst_17 = arith.constant 0.353553385 : f32
    %21 = vector.broadcast %cst_17 : f32 to vector<8x8xf32>
    %22 = arith.mulf %20, %21 : vector<8x8xf32>
    %cst_18 = arith.constant -1.000000e+06 : f32
    %23 = vector.broadcast %cst_18 : f32 to vector<8x8xf32>
    %24 = arith.select %16, %22, %23 : vector<8x8xi1>, vector<8x8xf32>
    %cst_19 = arith.constant dense<0xFF800000> : vector<8xf32>
    %25 = vector.multi_reduction <maximumf>, %24, %cst_19 [1] : vector<8x8xf32> to vector<8xf32>
    %26 = vector.shape_cast %25 : vector<8xf32> to vector<8x1xf32>
    %27 = vector.broadcast %26 : vector<8x1xf32> to vector<8x8xf32>
    %28 = arith.subf %24, %27 : vector<8x8xf32>
    %29 = math.exp %28 : vector<8x8xf32>
    %cst_20 = arith.constant dense<0.000000e+00> : vector<8xf32>
    %30 = vector.multi_reduction <add>, %29, %cst_20 [1] : vector<8x8xf32> to vector<8xf32>
    %31 = vector.shape_cast %30 : vector<8xf32> to vector<8x1xf32>
    %32 = vector.broadcast %31 : vector<8x1xf32> to vector<8x8xf32>
    %33 = arith.divf %29, %32 : vector<8x8xf32>
    %c0_21 = arith.constant 0 : index
    %c0_22 = arith.constant 0 : index
    %c0_23 = arith.constant 0 : index
    %34 = vector.load %arg10[%c0_21, %c0_22, %c0_23] : memref<4x8x8xf32, #tpu.memory_space<vmem>>, vector<1x8x8xf32>
    %35 = vector.shape_cast %34 : vector<1x8x8xf32> to vector<8x8xf32>
    %36 = vector.shape_cast %33 : vector<8x8xf32> to vector<1x8x8xf32>
    tpu.vector_store %arg10[%c0_21, %c0_22, %c0_23], %36 {strides = array<i32>} : memref<4x8x8xf32, #tpu.memory_space<vmem>>, vector<1x8x8xf32>,
    %cst_24 = arith.constant dense<0.000000e+00> : vector<8x8xf32>
    %37 = tpu.matmul %33, %19, %cst_24 {dimension_numbers = #tpu.dot_dimension_numbers<[1], [0], [0], [1], [0, 0, 1, 1], [], []>} : vector<8x8xf32>, vector<8x8xf32>, vector<8x8xf32> -> vector<8x8xf32>
    %38 = vector.extract_strided_slice %7 {offsets = [0, 8], sizes = [8, 8], strides = [1, 1]} : vector<8x32xf32> to vector<8x8xf32>
    %39 = vector.extract_strided_slice %9 {offsets = [0, 8], sizes = [8, 8], strides = [1, 1]} : vector<8x32xf32> to vector<8x8xf32>
    %40 = vector.extract_strided_slice %11 {offsets = [0, 8], sizes = [8, 8], strides = [1, 1]} : vector<8x32xf32> to vector<8x8xf32>
    %cst_25 = arith.constant dense<0.000000e+00> : vector<8x8xf32>
    %41 = tpu.matmul %38, %39, %cst_25 {dimension_numbers = #tpu.dot_dimension_numbers<[1], [1], [0], [0], [0, 0, 1, 0], [], []>} : vector<8x8xf32>, vector<8x8xf32>, vector<8x8xf32> -> vector<8x8xf32>
    %cst_26 = arith.constant 0.353553385 : f32
    %42 = vector.broadcast %cst_26 : f32 to vector<8x8xf32>
    %43 = arith.mulf %41, %42 : vector<8x8xf32>
    %cst_27 = arith.constant -1.000000e+06 : f32
    %44 = vector.broadcast %cst_27 : f32 to vector<8x8xf32>
    %45 = arith.select %16, %43, %44 : vector<8x8xi1>, vector<8x8xf32>
    %cst_28 = arith.constant dense<0xFF800000> : vector<8xf32>
    %46 = vector.multi_reduction <maximumf>, %45, %cst_28 [1] : vector<8x8xf32> to vector<8xf32>
    %47 = vector.shape_cast %46 : vector<8xf32> to vector<8x1xf32>
    %48 = vector.broadcast %47 : vector<8x1xf32> to vector<8x8xf32>
    %49 = arith.subf %45, %48 : vector<8x8xf32>
    %50 = math.exp %49 : vector<8x8xf32>
    %cst_29 = arith.constant dense<0.000000e+00> : vector<8xf32>
    %51 = vector.multi_reduction <add>, %50, %cst_29 [1] : vector<8x8xf32> to vector<8xf32>
    %52 = vector.shape_cast %51 : vector<8xf32> to vector<8x1xf32>
    %53 = vector.broadcast %52 : vector<8x1xf32> to vector<8x8xf32>
    %54 = arith.divf %50, %53 : vector<8x8xf32>
    %c1 = arith.constant 1 : index
    %c0_30 = arith.constant 0 : index
    %c0_31 = arith.constant 0 : index
    %55 = vector.load %arg10[%c1, %c0_30, %c0_31] : memref<4x8x8xf32, #tpu.memory_space<vmem>>, vector<1x8x8xf32>
    %56 = vector.shape_cast %55 : vector<1x8x8xf32> to vector<8x8xf32>
    %57 = vector.shape_cast %54 : vector<8x8xf32> to vector<1x8x8xf32>
    tpu.vector_store %arg10[%c1, %c0_30, %c0_31], %57 {strides = array<i32>} : memref<4x8x8xf32, #tpu.memory_space<vmem>>, vector<1x8x8xf32>,
    %cst_32 = arith.constant dense<0.000000e+00> : vector<8x8xf32>
    %58 = tpu.matmul %54, %40, %cst_32 {dimension_numbers = #tpu.dot_dimension_numbers<[1], [0], [0], [1], [0, 0, 1, 1], [], []>} : vector<8x8xf32>, vector<8x8xf32>, vector<8x8xf32> -> vector<8x8xf32>
    %59 = vector.extract_strided_slice %7 {offsets = [0, 16], sizes = [8, 8], strides = [1, 1]} : vector<8x32xf32> to vector<8x8xf32>
    %60 = vector.extract_strided_slice %9 {offsets = [0, 16], sizes = [8, 8], strides = [1, 1]} : vector<8x32xf32> to vector<8x8xf32>
    %61 = vector.extract_strided_slice %11 {offsets = [0, 16], sizes = [8, 8], strides = [1, 1]} : vector<8x32xf32> to vector<8x8xf32>
    %cst_33 = arith.constant dense<0.000000e+00> : vector<8x8xf32>
    %62 = tpu.matmul %59, %60, %cst_33 {dimension_numbers = #tpu.dot_dimension_numbers<[1], [1], [0], [0], [0, 0, 1, 0], [], []>} : vector<8x8xf32>, vector<8x8xf32>, vector<8x8xf32> -> vector<8x8xf32>
    %cst_34 = arith.constant 0.353553385 : f32
    %63 = vector.broadcast %cst_34 : f32 to vector<8x8xf32>
    %64 = arith.mulf %62, %63 : vector<8x8xf32>
    %cst_35 = arith.constant -1.000000e+06 : f32
    %65 = vector.broadcast %cst_35 : f32 to vector<8x8xf32>
    %66 = arith.select %16, %64, %65 : vector<8x8xi1>, vector<8x8xf32>
    %cst_36 = arith.constant dense<0xFF800000> : vector<8xf32>
    %67 = vector.multi_reduction <maximumf>, %66, %cst_36 [1] : vector<8x8xf32> to vector<8xf32>
    %68 = vector.shape_cast %67 : vector<8xf32> to vector<8x1xf32>
    %69 = vector.broadcast %68 : vector<8x1xf32> to vector<8x8xf32>
    %70 = arith.subf %66, %69 : vector<8x8xf32>
    %71 = math.exp %70 : vector<8x8xf32>
    %cst_37 = arith.constant dense<0.000000e+00> : vector<8xf32>
    %72 = vector.multi_reduction <add>, %71, %cst_37 [1] : vector<8x8xf32> to vector<8xf32>
    %73 = vector.shape_cast %72 : vector<8xf32> to vector<8x1xf32>
    %74 = vector.broadcast %73 : vector<8x1xf32> to vector<8x8xf32>
    %75 = arith.divf %71, %74 : vector<8x8xf32>
    %c2 = arith.constant 2 : index
    %c0_38 = arith.constant 0 : index
    %c0_39 = arith.constant 0 : index
    %76 = vector.load %arg10[%c2, %c0_38, %c0_39] : memref<4x8x8xf32, #tpu.memory_space<vmem>>, vector<1x8x8xf32>
    %77 = vector.shape_cast %76 : vector<1x8x8xf32> to vector<8x8xf32>
    %78 = vector.shape_cast %75 : vector<8x8xf32> to vector<1x8x8xf32>
    tpu.vector_store %arg10[%c2, %c0_38, %c0_39], %78 {strides = array<i32>} : memref<4x8x8xf32, #tpu.memory_space<vmem>>, vector<1x8x8xf32>,
    %cst_40 = arith.constant dense<0.000000e+00> : vector<8x8xf32>
    %79 = tpu.matmul %75, %61, %cst_40 {dimension_numbers = #tpu.dot_dimension_numbers<[1], [0], [0], [1], [0, 0, 1, 1], [], []>} : vector<8x8xf32>, vector<8x8xf32>, vector<8x8xf32> -> vector<8x8xf32>
    %80 = vector.extract_strided_slice %7 {offsets = [0, 24], sizes = [8, 8], strides = [1, 1]} : vector<8x32xf32> to vector<8x8xf32>
    %81 = vector.extract_strided_slice %9 {offsets = [0, 24], sizes = [8, 8], strides = [1, 1]} : vector<8x32xf32> to vector<8x8xf32>
    %82 = vector.extract_strided_slice %11 {offsets = [0, 24], sizes = [8, 8], strides = [1, 1]} : vector<8x32xf32> to vector<8x8xf32>
    %cst_41 = arith.constant dense<0.000000e+00> : vector<8x8xf32>
    %83 = tpu.matmul %80, %81, %cst_41 {dimension_numbers = #tpu.dot_dimension_numbers<[1], [1], [0], [0], [0, 0, 1, 0], [], []>} : vector<8x8xf32>, vector<8x8xf32>, vector<8x8xf32> -> vector<8x8xf32>
    %cst_42 = arith.constant 0.353553385 : f32
    %84 = vector.broadcast %cst_42 : f32 to vector<8x8xf32>
    %85 = arith.mulf %83, %84 : vector<8x8xf32>
    %cst_43 = arith.constant -1.000000e+06 : f32
    %86 = vector.broadcast %cst_43 : f32 to vector<8x8xf32>
    %87 = arith.select %16, %85, %86 : vector<8x8xi1>, vector<8x8xf32>
    %cst_44 = arith.constant dense<0xFF800000> : vector<8xf32>
    %88 = vector.multi_reduction <maximumf>, %87, %cst_44 [1] : vector<8x8xf32> to vector<8xf32>
    %89 = vector.shape_cast %88 : vector<8xf32> to vector<8x1xf32>
    %90 = vector.broadcast %89 : vector<8x1xf32> to vector<8x8xf32>
    %91 = arith.subf %87, %90 : vector<8x8xf32>
    %92 = math.exp %91 : vector<8x8xf32>
    %cst_45 = arith.constant dense<0.000000e+00> : vector<8xf32>
    %93 = vector.multi_reduction <add>, %92, %cst_45 [1] : vector<8x8xf32> to vector<8xf32>
    %94 = vector.shape_cast %93 : vector<8xf32> to vector<8x1xf32>
    %95 = vector.broadcast %94 : vector<8x1xf32> to vector<8x8xf32>
    %96 = arith.divf %92, %95 : vector<8x8xf32>
    %c3 = arith.constant 3 : index
    %c0_46 = arith.constant 0 : index
    %c0_47 = arith.constant 0 : index
    %97 = vector.load %arg10[%c3, %c0_46, %c0_47] : memref<4x8x8xf32, #tpu.memory_space<vmem>>, vector<1x8x8xf32>
    %98 = vector.shape_cast %97 : vector<1x8x8xf32> to vector<8x8xf32>
    %99 = vector.shape_cast %96 : vector<8x8xf32> to vector<1x8x8xf32>
    tpu.vector_store %arg10[%c3, %c0_46, %c0_47], %99 {strides = array<i32>} : memref<4x8x8xf32, #tpu.memory_space<vmem>>, vector<1x8x8xf32>,
    %cst_48 = arith.constant dense<0.000000e+00> : vector<8x8xf32>
    %100 = tpu.matmul %96, %82, %cst_48 {dimension_numbers = #tpu.dot_dimension_numbers<[1], [0], [0], [1], [0, 0, 1, 1], [], []>} : vector<8x8xf32>, vector<8x8xf32>, vector<8x8xf32> -> vector<8x8xf32>
    %101 = tpu.concatenate %37, %58, %79, %100 in 1 : vector<8x8xf32>, vector<8x8xf32>, vector<8x8xf32>, vector<8x8xf32> -> vector<8x32xf32>
    %c0_49 = arith.constant 0 : index
    %c0_50 = arith.constant 0 : index
    %102 = vector.load %arg9[%c0_49, %c0_50] : memref<32x32xf32, #tpu.memory_space<vmem>>, vector<32x32xf32>
    %cst_51 = arith.constant dense<0.000000e+00> : vector<8x32xf32>
    %103 = tpu.matmul %101, %102, %cst_51 {dimension_numbers = #tpu.dot_dimension_numbers<[1], [0], [0], [1], [0, 0, 1, 1], [], []>} : vector<8x32xf32>, vector<32x32xf32>, vector<8x32xf32> -> vector<8x32xf32>
    %c0_52 = arith.constant 0 : index
    %c0_53 = arith.constant 0 : index
    %c0_54 = arith.constant 0 : index
    %104 = vector.load %arg11[%c0_52, %c0_53, %c0_54] : memref<1x8x32xf32, #tpu.memory_space<vmem>>, vector<1x8x32xf32>
    %105 = vector.shape_cast %104 : vector<1x8x32xf32> to vector<8x32xf32>
    %106 = vector.shape_cast %103 : vector<8x32xf32> to vector<1x8x32xf32>
    tpu.vector_store %arg11[%c0_52, %c0_53, %c0_54], %106 {strides = array<i32>} : memref<1x8x32xf32, #tpu.memory_space<vmem>>, vector<1x8x32xf32>,
    return
  }
  func.func @transform_0(%arg0: i32, %arg1: i32, %arg2: memref<2xi32, #tpu.memory_space<smem>>) -> (i32, i32, i32) {
    %c0_i32 = arith.constant 0 : i32
    %c0_i32_0 = arith.constant 0 : i32
    return %arg0, %arg1, %c0_i32 : i32, i32, i32
  }
  func.func @transform_1(%arg0: i32, %arg1: i32, %arg2: memref<2xi32, #tpu.memory_space<smem>>) -> (i32, i32, i32) {
    %c0_i32 = arith.constant 0 : i32
    %c0_i32_0 = arith.constant 0 : i32
    %c0_i32_1 = arith.constant 0 : i32
    return %arg0, %c0_i32, %c0_i32_0 : i32, i32, i32
  }
  func.func @transform_2(%arg0: i32, %arg1: i32, %arg2: memref<2xi32, #tpu.memory_space<smem>>) -> (i32, i32, i32) {
    %c0_i32 = arith.constant 0 : i32
    %c0_i32_0 = arith.constant 0 : i32
    %c0_i32_1 = arith.constant 0 : i32
    return %arg0, %c0_i32, %c0_i32_0 : i32, i32, i32
  }
  func.func @transform_3(%arg0: i32, %arg1: i32, %arg2: memref<2xi32, #tpu.memory_space<smem>>) -> (i32, i32) {
    %c0_i32 = arith.constant 0 : i32
    %c0_i32_0 = arith.constant 0 : i32
    %c0_i32_1 = arith.constant 0 : i32
    return %c0_i32, %c0_i32_0 : i32, i32
  }
  func.func @transform_4(%arg0: i32, %arg1: i32, %arg2: memref<2xi32, #tpu.memory_space<smem>>) -> (i32, i32) {
    %c0_i32 = arith.constant 0 : i32
    %c0_i32_0 = arith.constant 0 : i32
    %c0_i32_1 = arith.constant 0 : i32
    return %c0_i32, %c0_i32_0 : i32, i32
  }
  func.func @transform_5(%arg0: i32, %arg1: i32, %arg2: memref<2xi32, #tpu.memory_space<smem>>) -> (i32, i32) {
    %c0_i32 = arith.constant 0 : i32
    %c0_i32_0 = arith.constant 0 : i32
    %c0_i32_1 = arith.constant 0 : i32
    return %c0_i32, %c0_i32_0 : i32, i32
  }
  func.func @transform_6(%arg0: i32, %arg1: i32, %arg2: memref<2xi32, #tpu.memory_space<smem>>) -> (i32, i32) {
    %c0_i32 = arith.constant 0 : i32
    %c0_i32_0 = arith.constant 0 : i32
    %c0_i32_1 = arith.constant 0 : i32
    return %c0_i32, %c0_i32_0 : i32, i32
  }
  func.func @transform_7(%arg0: i32, %arg1: i32, %arg2: memref<2xi32, #tpu.memory_space<smem>>) -> (i32, i32, i32) {
    %c0_i32 = arith.constant 0 : i32
    %c0_i32_0 = arith.constant 0 : i32
    return %arg0, %arg1, %c0_i32 : i32, i32, i32
  }
  func.func @transform_8(%arg0: i32, %arg1: i32, %arg2: memref<2xi32, #tpu.memory_space<smem>>) -> (i32, i32, i32) {
    %c0_i32 = arith.constant 0 : i32
    %c0_i32_0 = arith.constant 0 : i32
    return %arg0, %arg1, %c0_i32 : i32, i32, i32
  }
}

</mosaic_0001>

<bundles_post_ra>
// kernel: tpu_custom_call.1
= control target key start
LH: loop header
LB: loop body
LE: loop exit
PB: predicated region body
PF: predicated region fallthrough
CT: control target
= control target key end

     0   :  { %s2364_s30 = smov [#allocation3]   ;;  %s2864_s0 = inlined_call_operand.hbm [shape: s32[2], index: 0, kind: input, shape index: {}]   ;;  %s2865_s1 = inlined_call_operand.hbm [shape: f32[2,8,32], index: 1, kind: input, shape index: {}]   ;;  %s2866_s2 = inlined_call_operand.hbm [shape: f32[2,8,32], index: 2, kind: input, shape index: {}]   ;;  %s2867_s3 = inlined_call_operand.hbm [shape: f32[2,8,32], index: 3, kind: input, shape index: {}]   ;;  %s2868_s4 = inlined_call_operand.hbm [shape: f32[32,32], index: 4, kind: input, shape index: {}]   ;;  %s2869_s5 = inlined_call_operand.hbm [shape: f32[32,32], index: 5, kind: input, shape index: {}]   ;;  %s2870_s6 = inlined_call_operand.hbm [shape: f32[32,32], index: 6, kind: input, shape index: {}]   ;;  %s2871_s7 = inlined_call_operand.hbm [shape: f32[32,32], index: 7, kind: input, shape index: {}]   ;;  %s2872_s8 = inlined_call_operand.hbm [shape: f32[8,8,8], index: 8, kind: output, shape index: {0}]   ;;  %s2873_s9 = inlined_call_operand.hbm [shape: f32[2,8,32], index: 9, kind: output, shape index: {1}]  }
   0x1   :  { %2889 = sst [smem:[#allocation32_spill]] %s2866_s2 }
   0x2   :  { %2890 = sst [smem:[#allocation33_spill]] %s2868_s4 }
   0x3   :  { %2891 = sst [smem:[#allocation34_spill]] %s2869_s5 }
   0x4   :  { %2892 = sst [smem:[#allocation35_spill]] %s2870_s6 }
   0x5   :  { %16 = dma.hbm_to_smem %s2864_s0, 16, %s2364_s30, [#allocation2] }
   0x6   :  { %2314 = dma.done.wait [#allocation2], 16 }
   0x7   :  { %2315 = vsyncadd [#allocation2], 4294967280 }
   0x8   :  { %18 = sfence }
   0x9   :  { %19 = vsyncpa [#allocation5], 0 }
   0xa   :  { %21 = vsyncpa [#allocation5 + $0x1], 0 }
   0xb   :  { %22 = vsyncpa [#allocation8], 0 }
   0xc   :  { %24 = vsyncpa [#allocation8 + $0x1], 0 }
   0xd   :  { %25 = vsyncpa [#allocation11], 0 }
   0xe   :  { %26 = vsyncpa [#allocation14], 0 }
   0xf   :  { %27 = vsyncpa [#allocation6], 0 }
  0x10   :  { %29 = vsyncpa [#allocation6 + $0x1], 0 }
  0x11   :  { %30 = vsyncpa [#allocation18], 0 }
  0x12   :  { %32 = vsyncpa [#allocation18 + $0x1], 0  ;;  %s2438_s12 = smov 0   ;;  %s2440_s13 = smov 0  }
  0x13   :  { %s2442_s14 = smov 0   ;;  %s2444_s0 = smov 0  }
  0x14   :  { %s2446_s15 = smov 0   ;;  %s2448_s16 = smov 0  }
  0x15 LB: > { %2893 = sst [smem:[#allocation26_spill]] %s2342_s12  ;;  %s2469_s17 = sadd.s32 4294967295, %s2362_s16   ;;  %s2362_s16 = sphi %s2448_s16, %s38_s16   ;;  %s2358_s15 = sphi %s2446_s15, %s2931_s15   ;;  %s2354_s0 = sphi %s2444_s0, %s2930_s0   ;;  %s2350_s14 = sphi %s2442_s14, %s2934_s14   ;;  %s2346_s13 = sphi %s2440_s13, %s2933_s13   ;;  %s2342_s12 = sphi %s2438_s12, %s2932_s12  }
  0x16   : > { %2894 = sst [smem:[#allocation27_spill]] %s2358_s15  ;;  %p1727_p0 = scmp.ge.s32.totalorder %s2362_s16, 1 }
  0x17   : > { %2895 = sst [smem:[#allocation28_spill]] %s2362_s16  ;;  %p2883_p1 = scmp.eq.s32.totalorder %s2469_s17, 0 }
  0x18   : > { %p275_p2 = scmp.lt.s32.totalorder %s2362_s16, 3  ;;  %s2365_s19 = smov [#allocation10]  }
  0x19   : > { %s287_s20 = sshll.u32 %s2365_s19, 4  ;;  %s2366_s22 = smov [#allocation13]   ;;  %s288_s20 = int_to_ptr.vmem [resolvable:$true] %s287_s20 }
  0x1a   : > { %p2474_p3 = pnand %p1727_p0, %p275_p2  ;;  %s313_s23 = sshll.u32 %s2366_s22, 4  ;;  %s314_s23 = int_to_ptr.vmem [resolvable:$true] %s313_s23 }
  0x1b   : > { %s2061_s24 = scalar_lea.vmem %s288_s20, 512  ;;  %p2069_p11 = scmp.lt.s32.totalorder %s288_s20, %s288_s20 }
  0x1c   : > { %p1922_p4 = pneg %p2474_p3  ;;  %p2062_p8 = scmp.ne.s32.totalorder %s288_s20, %s2061_s24 }
  0x1d   : > { %p2070_p12 = scmp.lt.s32.totalorder %s2061_s24, %s2061_s24 }
  0x1e   : > { %p2483_p6 = pnand %p1922_p4, %p2883_p1 }
  0x1f   : > { %p2071_p13 = por %p2070_p12, %p2069_p11 }
  0x20   : > { %p2884_p7 = pneg %p2483_p6 }
  0x22   : > { %p2064_p9 = pnand %p2062_p8, %p2884_p7 }
  0x24   : > { %p2065_p10 = pneg %p2064_p9 }
  0x26   : > { %p2072_p0 = pnand %p2071_p13, %p2065_p10 }
  0x28   : > { %2075 = shalt.err (!%p2072_p0)
}
  0x29   : > { %s2874_s25 = smov 128   ;;  %s2876_s26 = smov 8  }
  0x2a   : > { %s2898_s4 = sld [smem:[#allocation33_spill]]  ;;  %s2087_s29 = scalar_lea.vmem %s314_s23, 512 }
  0x2b   : > { %p2088_p2 = scmp.ne.s32.totalorder %s314_s23, %s2087_s29  ;;  %p2095_p9 = scmp.lt.s32.totalorder %s314_s23, %s314_s23 }
  0x2c   : > { %p2096_p10 = scmp.lt.s32.totalorder %s2087_s29, %s2087_s29 }
  0x2d   : > { %p2090_p4 = pnand %p2088_p2, %p2884_p7 }
  0x2e   : > { %p2097_p11 = por %p2096_p10, %p2095_p9 }
  0x2f   : > { %p2091_p8 = pneg %p2090_p4 }
  0x30   : > { %1925 = dma.hbm_to_vmem [thread:$0]  (!%p2483_p6), %s2898_s4, 512, %s288_s20, [#allocation11], %s2874_s25, %s2874_s25, %s2876_s26  }
  0x31   : > { %p2098_p12 = pnand %p2097_p11, %p2091_p8 }
  0x33   : > { %2101 = shalt.err (!%p2098_p12)
}
  0x34   : > { %s2899_s6 = sld [smem:[#allocation35_spill]]  ;;  %s1726_s11 = sadd.s32 4294967294, %s2362_s16  }
  0x35   : > { %s50_s19 = sadd.s32 1, %s2358_s15  ;;  %s59_s20 = sadd.s32 1, %s2350_s14 }
  0x36   : > { %p52_p13 = scmp.ge.s32.totalorder %s50_s19, 2  ;;  %p66_p0 = scmp.ne.s32.totalorder %s2350_s14, %s2346_s13 }
  0x37   : > { %p67_p2 = scmp.eq.s32.totalorder %s2362_s16, 0  ;;  %p72_p8 = scmp.ne.s32.totalorder %s2346_s13, %s2342_s12 }
  0x38   : > { %s2936_s19 = smov (%p52_p13, %s50_s19), 0  ;;  %p234_p9 = scmp.eq.s32.totalorder %s2469_s17, 1 }
  0x39   : > { %2900 = sst [smem:[#allocation29_spill]] %s2936_s19  ;;  %p2519_p4 = por %p67_p2, %p66_p0 }
  0x3a   : > { %1931 = dma.hbm_to_vmem [thread:$0]  (!%p2483_p6), %s2899_s6, 512, %s314_s23, [#allocation14], %s2874_s25, %s2874_s25, %s2876_s26  }
  0x3b   : > { %s54_s23 = ssub.s32 %s2358_s15, %s2936_s19  ;;  %p2530_p11 = por %p2883_p1, %p72_p8 }
  0x3c   : > { %p57_p10 = scmp.eq.s32.totalorder %s54_s23, 0  ;;  %p2534_p12 = por %p234_p9, %p66_p0 }
  0x3d   : > { %p240_p13 = scmp.eq.s32.totalorder %s1726_s11, 1  ;;  %p1956_p5 = scmp.lt.s32.totalorder %s2362_s16, 2 }
  0x3e   : > { %s2903_s27 = scalar_select %p2534_p12, 1, 0 }
  0x3f   : > { %s2539_s28 = scalar_select %p57_p10, %s2350_s14, %s59_s20  }
  0x40   : > { %p2541_p2 = por %p240_p13, %p72_p8  ;;  %s2880_s30 = sand.u32 1, %s2350_s14  }
  0x41   : > { %2904 = sst [smem:[#allocation30_spill]] %s2539_s28  ;;  %s2548_s10 = sshll.u32 %s2358_s15, 7 }
  0x42   : > { %s2905_s29 = scalar_select %p2541_p2, 1, 0 }
  0x43   : > { %s2552_s23 = sshll.u32 %s2880_s30, 3  ;;  %p2556_p0 = pnand %p1956_p5, %p2519_p4 }
  0x44   : > { %2906 = sst [smem:[#allocation31_spill]] %s2905_s29  ;;  %s359_s11 = sand.u32 1, %s2362_s16  }
  0x45   : > { %s2908_s2 = sld [smem:[#allocation32_spill]]  ;;  %s363_s6 = scalar_lea.vmem [#allocation7], %s2552_s23 }
  0x46   : > { %s370_s19 = sshll.u32 %s363_s6, 4  ;;  %s2566_s15 = scalar_lea.sflag [#allocation8], %s359_s11  ;;  %s371_s19 = int_to_ptr.vmem [resolvable:$true] %s370_s19 }
  0x47   : > { %p2885_p8 = pneg %p2556_p0  ;;  %s2115_s22 = scalar_lea.vmem %s371_s19, 128 }
  0x48   : > { %p2116_p9 = scmp.ne.s32.totalorder %s371_s19, %s2115_s22  ;;  %s2369_s30 = smov [#allocation7]  }
  0x49   : > { %s2120_s28 = sshll.u32 %s2369_s30, 4  ;;  %s2121_s28 = int_to_ptr.vmem [resolvable:$false] %s2120_s28 }
  0x4a   : > { %p2118_p5 = pnand %p2116_p9, %p2885_p8  ;;  %s2122_s16 = scalar_lea.vmem %s2121_s28, 256 }
  0x4b   : > { %s368_s4 = scalar_lea.hbm %s2908_s2, %s2548_s10  ;;  %p2123_p10 = scmp.lt.s32.totalorder %s371_s19, %s2121_s28 }
  0x4c   : > { %p2119_p4 = pneg %p2118_p5  ;;  %p2124_p13 = scmp.lt.s32.totalorder %s2122_s16, %s2115_s22 }
  0x4e   : > { %p2125_p1 = por %p2124_p13, %p2123_p10 }
  0x50   : > { %p2126_p7 = pnand %p2125_p1, %p2119_p4 }
  0x52   : > { %2129 = shalt.err (!%p2126_p7)
}
  0x53   : > { %1941 = dma.hbm_to_vmem [thread:$0]  (!%p2556_p0), %s368_s4, 128, %s371_s19, %s2566_s15  }
  0x54   : > { %s2370_s6 = smov [#allocation12]   ;;  %s2371_s11 = smov [#allocation15]  }
  0x55   : > { %s300_s26 = sshll.u32 %s2370_s6, 4  ;;  %s326_s20 = sshll.u32 %s2371_s11, 4  ;;  %s301_s26 = int_to_ptr.vmem [resolvable:$true] %s300_s26  ;;  %s327_s20 = int_to_ptr.vmem [resolvable:$true] %s326_s20 }
  0x56   : > { %s2141_s2 = scalar_lea.vmem %s301_s26, 512  ;;  %p2909_p5 = pneg %p2483_p6 }
  0x57   : > { %p2142_p9 = scmp.ne.s32.totalorder %s301_s26, %s2141_s2  ;;  %p2149_p12 = scmp.lt.s32.totalorder %s301_s26, %s301_s26 }
  0x58   : > { %p2150_p10 = scmp.lt.s32.totalorder %s2141_s2, %s2141_s2 }
  0x59   : > { %p2144_p8 = pnand %p2142_p9, %p2909_p5 }
  0x5a   : > { %p2151_p1 = por %p2150_p10, %p2149_p12 }
  0x5b   : > { %p2145_p2 = pneg %p2144_p8 }
  0x5d   : > { %p2152_p7 = pnand %p2151_p1, %p2145_p2 }
  0x5f   : > { %2155 = shalt.err (!%p2152_p7)
}
  0x60   : > { %s2910_s16 = smov 8   ;;  %s2911_s4 = smov 128  }
  0x61   : > { %s2912_s5 = sld [smem:[#allocation34_spill]]  ;;  %s2167_s30 = scalar_lea.vmem %s327_s20, 512 }
  0x62   : > { %p2168_p4 = scmp.ne.s32.totalorder %s327_s20, %s2167_s30  ;;  %p2913_p8 = pmov %p2909_p5 }
  0x63   : > { %p2175_p12 = scmp.lt.s32.totalorder %s327_s20, %s327_s20  ;;  %p2176_p2 = scmp.lt.s32.totalorder %s2167_s30, %s2167_s30 }
  0x64   : > { %p2170_p13 = pnand %p2168_p4, %p2913_p8 }
  0x65   : > { %p2177_p5 = por %p2176_p2, %p2175_p12 }
  0x66   : > { %p2171_p9 = pneg %p2170_p13 }
  0x67   : > { %1928 = dma.hbm_to_vmem [thread:$0]  (!%p2483_p6), %s2912_s5, 512, %s301_s26, [#allocation11], %s2911_s4, %s2911_s4, %s2910_s16  }
  0x68   : > { %p2178_p10 = pnand %p2177_p5, %p2171_p9 }
  0x6a   : > { %2181 = shalt.err (!%p2178_p10)
}
  0x6b   : > { %1934 = dma.hbm_to_vmem [thread:$0]  (!%p2483_p6), %s2871_s7, 512, %s327_s20, [#allocation14], %s2911_s4, %s2911_s4, %s2910_s16  }
  0x6c   : > { %s350_s11 = scalar_lea.hbm %s2865_s1, %s2548_s10  ;;  %s344_s19 = scalar_lea.vmem [#allocation4], %s2552_s23 }
  0x6d   : > { %s352_s28 = sshll.u32 %s344_s19, 4  ;;  %s386_s5 = scalar_lea.hbm %s2867_s3, %s2548_s10  ;;  %s353_s28 = int_to_ptr.vmem [resolvable:$true] %s352_s28 }
  0x6e   : > { %s2914_s29 = sand.u32 1, %s2350_s14   ;;  %s2195_s2 = scalar_lea.vmem %s353_s28, 128 }
  0x6f   : > { %s341_s12 = scalar_lea.sflag [#allocation5], %s2914_s29  ;;  %p2196_p1 = scmp.ne.s32.totalorder %s353_s28, %s2195_s2 }
  0x70   : > { %p2915_p7 = pneg %p2556_p0  ;;  %s2372_s20 = smov [#allocation4]  }
  0x71   : > { %s2200_s16 = sshll.u32 %s2372_s20, 4  ;;  %s2201_s16 = int_to_ptr.vmem [resolvable:$false] %s2200_s16 }
  0x72   : > { %p2198_p4 = pnand %p2196_p1, %p2915_p7  ;;  %s2202_s4 = scalar_lea.vmem %s2201_s16, 256 }
  0x73   : > { %p2203_p6 = scmp.lt.s32.totalorder %s353_s28, %s2201_s16  ;;  %p2204_p13 = scmp.lt.s32.totalorder %s2202_s4, %s2195_s2 }
  0x74   : > { %p2199_p8 = pneg %p2198_p4 }
  0x75   : > { %p2205_p9 = por %p2204_p13, %p2203_p6 }
  0x77   : > { %p2206_p12 = pnand %p2205_p9, %p2199_p8 }
  0x79   : > { %2209 = shalt.err (!%p2206_p12)
}
  0x7a   : > { %1938 = dma.hbm_to_vmem [thread:$0]  (!%p2556_p0), %s350_s11, 128, %s353_s28, %s341_s12  }
  0x7b   : > { %s381_s29 = scalar_lea.vmem [#allocation9], %s2552_s23  ;;  %p2916_p5 = pmov %p2915_p7 }
  0x7c   : > { %s388_s22 = sshll.u32 %s381_s29, 4  ;;  %s2373_s26 = smov [#allocation9]   ;;  %s389_s22 = int_to_ptr.vmem [resolvable:$true] %s388_s22 }
  0x7d   : > { %s2223_s6 = scalar_lea.vmem %s389_s22, 128  ;;  %s2228_s19 = sshll.u32 %s2373_s26, 4  ;;  %s2229_s19 = int_to_ptr.vmem [resolvable:$false] %s2228_s19 }
  0x7e   : > { %p2224_p2 = scmp.ne.s32.totalorder %s389_s22, %s2223_s6  ;;  %s2230_s21 = scalar_lea.vmem %s2229_s19, 256 }
  0x7f   : > { %p2231_p7 = scmp.lt.s32.totalorder %s389_s22, %s2229_s19  ;;  %p2232_p4 = scmp.lt.s32.totalorder %s2230_s21, %s2223_s6 }
  0x80   : > { %p2226_p10 = pnand %p2224_p2, %p2916_p5 }
  0x81   : > { %p2233_p8 = por %p2232_p4, %p2231_p7 }
  0x82   : > { %p2227_p1 = pneg %p2226_p10 }
  0x84   : > { %p2234_p6 = pnand %p2233_p8, %p2227_p1 }
  0x86   : > { %2237 = shalt.err (!%p2234_p6)
}
  0x87   : > { %1944 = dma.hbm_to_vmem [thread:$0]  (!%p2556_p0), %s386_s5, 128, %s389_s22, %s2566_s15  }
  0x88   : > { %397 = sbr.rel (%p2474_p3) target bundleno = 1959 (0x7a7), region = 48  ;;  %s2629_s11 = sand.u32 (!%p2474_p3), 1, %s2346_s13  }
  0x89   : > { %s2632_s28 = sshll.u32 (!%p2474_p3), %s2629_s11, 3  ;;  %s400_s25 = scalar_lea.sflag (!%p2474_p3), [#allocation5], %s2629_s11 }
  0x8a   : > { %s403_s30 = scalar_lea.vmem (!%p2474_p3), [#allocation4], %s2632_s28 }
  0x8d   : > { %2317 = dma.done.wait (%p2530_p11), %s400_s25, 128  }
  0x8e   : > { %2319 = vsyncadd (%p2530_p11), %s400_s25, 4294967168  ;;  %s408_s5 = sand.u32 1, %s2469_s17   ;;  %s412_s18 = scalar_lea.vmem [#allocation7], %s2632_s28 }
  0x8f   : > { %s409_s15 = scalar_lea.sflag [#allocation8], %s408_s5 }
  0x90   : > { %2321 = dma.done.wait (%p2530_p11), %s409_s15, 256  }
  0x91   : > { %2323 = vsyncadd (%p2530_p11), %s409_s15, 4294967040  ;;  %s421_s10 = scalar_lea.vmem [#allocation9], %s2632_s28  ;;  %p2917_p3 = scmp.eq.s32.totalorder %s2469_s17, 0 }
  0x93   : > { %2325 = dma.done.wait (%p2917_p3), [#allocation11], 1024   ;;  %p2918_p0 = pmov %p2917_p3 }
  0x95   : > { %2327 = vsyncadd (%p2918_p0), [#allocation11], 4294966272  ;;  %p2919_p13 = pmov %p2918_p0 }
  0x96   : > { %p2920_p9 = pmov %p2918_p0 }
  0x97   : > { %2329 = dma.done.wait (%p2919_p13), [#allocation14], 1024  }
  0x98   : > { %2331 = vsyncadd (%p2920_p9), [#allocation14], 4294966272  ;;  %v2374_v0 = vmov 0.0   ;;  %vm2375_vm0 = vmmov 0   ;;  %v570_v1 = vld [vmem:[#allocation12 + $0x18] sm:$0xff]  ;;  %v569_v3 = vld [vmem:[#allocation12 + $0x10] sm:$0xff]  ;;  %v722_v20 = vlaneseq }
  0x99   : > { %1823 = vmatprep.subr.mxu1 %v2374_v0  ;;  %1812 = vmatprep.subr.mxu0 %v2374_v0  ;;  %v492_v2 = vld [vmem:[#allocation10 + $0x18] sm:$0xff]  ;;  %v491_v4 = vld [vmem:[#allocation10 + $0x10] sm:$0xff]  ;;  %v568_v5 = vld [vmem:[#allocation12 + $0x8] sm:$0xff]  ;;  %vm493_vm1 = vcmask 261120   ;;  %vm726_vm2 = vcmask 64512   ;;  %s2376_s17 = smov 120  }
  0x9a   : > { %1831 = vmatprep.mubr.msk.f32.mxu1 %vm2375_vm0, %v2374_v0  ;;  %1820 = vmatprep.mubr.msk.f32.mxu0 %vm2375_vm0, %v2374_v0  ;;  %v490_v6 = vld [vmem:[#allocation10 + $0x8] sm:$0xff]  ;;  %v567_v7 = vld [vmem:[#allocation12] sm:$0xff]  ;;  %v486_v10 = vld [vmem:[%s403_s30] sm:$0xff]  ;;  %s2377_s24 = smov 112   ;;  %s2378_s2 = smov 104   ;;  %v723_v21 = vand.u32 127, %v722_v20 }
  0x9b   : > { %1824 = vmatpush3.msra.mxu1 %v570_v1  ;;  %1813 = vmatpush3.msra.mxu0 %v492_v2  ;;  %v489_v8 = vld [vmem:[#allocation10] sm:$0xff]  ;;  %v647_v15 = vld [vmem:[#allocation13 + $0x18] sm:$0xff]  ;;  %v646_v16 = vld [vmem:[#allocation13 + $0x10] sm:$0xff]  ;;  %s721_s20 = sld [smem:[#allocation3 + %s2354_s0]]  ;;  %s1747_s16 = sshll.u32 %s2629_s11, 5  ;;  %vm1411_vm4 = vcmask 130048  }
  0x9c   : > { %1825 = vmatprep.subr.mxu1 %v2374_v0  ;;  %1814 = vmatprep.subr.mxu0 %v2374_v0  ;;  %v487_v9 = vld [vmem:[%s412_s18] sm:$0xff]  ;;  %v488_v19 = vld [vmem:[%s421_s10] sm:$0xff]  ;;  %s2723_s4 = scalar_lea.vmem [#allocation16], %s1747_s16  ;;  %s2379_s29 = smov 8   ;;  %vm1413_vm5 = vcmask 195584  }
  0x9d   : > { %1826 = vmatpush3.msra.mxu1 %v569_v3  ;;  %1815 = vmatpush3.msra.mxu0 %v491_v4  ;;  %v645_v17 = vld [vmem:[#allocation13 + $0x8] sm:$0xff]  ;;  %v644_v18 = vld [vmem:[#allocation13] sm:$0xff]  ;;  %s2380_s22 = smov 16   ;;  %s2381_s6 = smov 24  }
  0x9e   : > { %1827 = vmatprep.subr.mxu1 %v2374_v0  ;;  %1816 = vmatprep.subr.mxu0 %v2374_v0  ;;  %s1775_s26 = sshll.u32 %s2354_s0, 9  ;;  %s1513_s19 = sshll.u32 %s2723_s4, 4  ;;  %s2784_s19 = int_to_ptr.vmem [resolvable:$true] %s1513_s19 }
  0x9f   : > { %1828 = vmatpush3.msra.mxu1 %v568_v5  ;;  %1817 = vmatpush3.msra.mxu0 %v490_v6  ;;  %s2782_s23 = scalar_lea.hbm %s2872_s8, %s1775_s26  ;;  %s1494_s25 = scalar_lea.sflag [#allocation6], %s2629_s11 }
  0xa0   : > { %1829 = vmatprep.subr.mxu1 %v2374_v0  ;;  %1818 = vmatprep.subr.mxu0 %v2374_v0  ;;  %s2238_s30 = scalar_lea.vmem %s2784_s19, 512  ;;  %p2923_p12 = scmp.ne.s32.totalorder %s2903_s27, 0 }
  0xa1   : > { %1830 = vmatpush3.msra.mxu1 %v567_v7  ;;  %1819 = vmatpush3.msra.mxu0 %v489_v8  ;;  %v724_v22 = vstv %s721_s20  ;;  %p2239_p11 = scmp.ne.s32.totalorder %s2784_s19, %s2238_s30  ;;  %s2382_s5 = smov [#allocation16]  }
  0xa2   : > { %1832 = vmatmul.mubr.msk.f32.vlgmr.msra.gmra.mxu1 %vm493_vm1, %v487_v9  ;;  %1821 = vmatmul.mubr.msk.f32.vlgmr.msra.gmra.mxu0 %vm493_vm1, %v486_v10  ;;  %vm2699_vm3 = vcmp.lt.s32.totalorder %v723_v21, %v724_v22  ;;  %s2242_s15 = sshll.u32 %s2382_s5, 4  ;;  %s2243_s15 = int_to_ptr.vmem [resolvable:$false] %s2242_s15 }
  0xa3   : > { %1845 = vmatprep.subr.mxu1 %v2374_v0  ;;  %1847 = vmatprep.mubr.msk.f32.mxu1 %vm2375_vm0, %v2374_v0  ;;  %p2240_p2 = pnand %p2239_p11, %p2923_p12  ;;  %s2244_s18 = scalar_lea.vmem %s2243_s15, 1024 }
  0xa4   : > { %1834 = vmatprep.subr.mxu0 %v2374_v0  ;;  %1842 = vmatprep.mubr.msk.f32.mxu0 %vm2375_vm0, %v2374_v0  ;;  %p2245_p10 = scmp.lt.s32.totalorder %s2784_s19, %s2243_s15  ;;  %p2246_p1 = scmp.lt.s32.totalorder %s2244_s18, %s2238_s30 }
  0xa5   : > { %1835 = vmatpush3.msra.mxu0 %v647_v15  ;;  %p2241_p5 = pneg %p2240_p2 }
  0xa6   : > { %1836 = vmatprep.subr.mxu0 %v2374_v0  ;;  %p2247_p7 = por %p2246_p1, %p2245_p10 }
  0xa7   : > { %1837 = vmatpush3.msra.mxu0 %v646_v16 }
  0xa8   : > { %1838 = vmatprep.subr.mxu0 %v2374_v0  ;;  %p2248_p4 = pnand %p2247_p7, %p2241_p5 }
  0xa9   : > { %1839 = vmatpush3.msra.mxu0 %v645_v17 }
  0xaa   : > { %1840 = vmatprep.subr.mxu0 %v2374_v0 }
  0xab   : > { %1841 = vmatpush3.msra.mxu0 %v644_v18 }
  0xac   : > { %1843 = vmatmul.mubr.msk.f32.vlgmr.msra.gmra.mxu0 %vm493_vm1, %v488_v19  ;;  %1865 = vmatprep.subr.mxu0 %v2374_v0 }
  0xad   : > { %1867 = vmatprep.mubr.msk.f32.mxu0 %vm2375_vm0, %v2374_v0 }
 0x162   : > { %v640_v11 = vpop.f32.mrf.mxu1  ;;  %v563_v12 = vpop.f32.mrf.mxu0 }
 0x163   : > { %892 = vrot.lane.b32.xlu1 %v640_v11, %s2376_s17  ;;  %1846 = vmatpush3.xpose.msk.msra.mxu1 %vm726_vm2, %v640_v11 }
 0x164   : > { %v1833_v13 = vpop.f32.mrf.mxu1  ;;  %v1822_v14 = vpop.f32.mrf.mxu0  ;;  %1850 = vmatprep.subr.mxu1 %v2374_v0 }
 0x166   : > { %1848 = vmatmul.mubr.msk.f32.vlgmr.msra.gmra.mxu1 %vm726_vm2, %v563_v12 }
 0x167   : > { %890 = vrot.lane.b32.xlu1 %v563_v12, %s2376_s17  ;;  %1852 = vmatprep.mubr.msk.f32.mxu1 %vm2375_vm0, %v2374_v0 }
 0x16b   : > { %1060 = vrot.lane.b32.xlu1 %v563_v12, %s2377_s24 }
 0x16c   : > { %v2707_v34 = vpop.f32.mrf.mxu0 }
 0x16d   : > { %1851 = vmatpush3.msra.mxu1 %v2707_v34 }
 0x16e   : > { %v1844_v35 = vpop.f32.mrf.mxu0  ;;  %1855 = vmatprep.subr.mxu1 %v2374_v0 }
 0x16f   : > { %1231 = vrot.lane.b32.xlu1 %v640_v11, %s2378_s2 }
 0x173   : > { %1229 = vrot.lane.b32.xlu1 %v563_v12, %s2378_s2 }
 0x1d5   : > { %v893_v36 = vpop.permute.xlu1 %892 }
 0x1d9   : > { %v891_v37 = vpop.permute.xlu1 %890 }
 0x1dd   : > { %v1061_v38 = vpop.permute.xlu1 %1060 }
 0x1e1   : > { %v1232_v41 = vpop.permute.xlu1 %1231 }
 0x1e5   : > { %v1230_v42 = vpop.permute.xlu1 %1229 }
 0x226   : > { %v799_v23 = vpop.f32.mrf.mxu1 }
 0x227   : > { %v803_v25 = vmul.f32 0.35355338, %v799_v23 }
 0x228   : > { %v1849_v26 = vpop.f32.mrf.mxu1 }
 0x229   : > { %v804_v27 = vsel %vm2699_vm3, %v803_v25, -1000000.0  ;;  %v1418_v26 = vld [vmem:[#allocation15 + $0x18] sm:$0xff] }
 0x22a   : > { %v805_v28 = vsel %vm726_vm2, %v804_v27, -inf }
 0x22b   : > { %806 = vmax.xlane.f32.xlu0 %v805_v28  ;;  %v1416_v28 = vld [vmem:[#allocation15 + $0x8] sm:$0xff] }
 0x2b4   : > { %v807_v29 = vpop.xlane.xlu0 %806 }
 0x2b5   : > { %v808_v30 = vsub.f32 %v804_v27, %v807_v29  ;;  %v1417_v27 = vld [vmem:[#allocation15 + $0x10] sm:$0xff]  ;;  %v1415_v29 = vld [vmem:[#allocation15] sm:$0xff] }
 0x2b7   : > { %v809_v31 = vmul.f32 1.442695, %v808_v30 }
 0x2b9   : > { %2026 = vpow2.f32 %v809_v31 }
 0x2c6   : > { %v2027_v32 = vpop.eup %2026 }
 0x2c7   : > { %v811_v33 = vsel %vm726_vm2, %v2027_v32, 0.0 }
 0x2c8   : > { %812 = vadd.xlane.f32.xlu0 %v811_v33 }
 0x2de   : > { %1062 = vrot.lane.b32.xlu0 %v640_v11, %s2377_s24 }
 0x351   : > { %v813_v39 = vpop.xlane.xlu0 %812 }
 0x352   : > { %2028 = vrcp.f32 %v813_v39 }
 0x355   : > { %v1063_v40 = vpop.permute.xlu0 %1062 }
 0x356   : > { %1866 = vmatpush3.xpose.msk.msra.mxu0 %vm726_vm2, %v1063_v40 }
 0x357   : > { %1875 = vmatprep.subr.mxu0 %v2374_v0 }
 0x359   : > { %1868 = vmatmul.mubr.msk.f32.vlgmr.msra.gmra.mxu0 %vm726_vm2, %v1061_v38 }
 0x35a   : > { %1876 = vmatpush3.xpose.msk.msra.mxu0 %vm726_vm2, %v1232_v41  ;;  %1877 = vmatprep.mubr.msk.f32.mxu0 %vm2375_vm0, %v2374_v0 }
 0x35b   : > { %1885 = vmatprep.subr.mxu0 %v2374_v0 }
 0x35d   : > { %1878 = vmatmul.mubr.msk.f32.vlgmr.msra.gmra.mxu0 %vm726_vm2, %v1230_v42 }
 0x35e   : > { %1893 = vmatprep.mubr.msk.f32.mxu0 %vm2375_vm0, %v2374_v0  ;;  %1886 = vmatpush3.msra.mxu0 %v1418_v26 }
 0x35f   : > { %v2029_v43 = vpop.eup %2028  ;;  %1887 = vmatprep.subr.mxu0 %v2374_v0 }
 0x360   : > { %v815_v44 = vmul.f32 %v2029_v43, %v2027_v32  ;;  %1888 = vmatpush3.msra.mxu0 %v1417_v27 }
 0x361   : > { %1889 = vmatprep.subr.mxu0 %v2374_v0 }
 0x362   : > { %816 = vst.msk [vmem:[%s2723_s4] sm:$0xff] %vm726_vm2, %v815_v44  ;;  %1853 = vmatmul.mubr.msk.f32.vlgmr.msra.gmra.mxu1 %vm726_vm2, %v815_v44  ;;  %1890 = vmatpush3.msra.mxu0 %v1416_v28 }
 0x363   : > { %1856 = vmatpush3.xpose.msk.msra.mxu1 %vm726_vm2, %v893_v36  ;;  %1857 = vmatprep.mubr.msk.f32.mxu1 %vm2375_vm0, %v2374_v0 }
 0x364   : > { %1860 = vmatprep.subr.mxu1 %v2374_v0  ;;  %1891 = vmatprep.subr.mxu0 %v2374_v0 }
 0x365   : > { %1892 = vmatpush3.msra.mxu0 %v1415_v29 }
 0x366   : > { %1858 = vmatmul.mubr.msk.f32.vlgmr.msra.gmra.mxu1 %vm726_vm2, %v891_v37 }
 0x367   : > { %1862 = vmatprep.mubr.msk.f32.mxu1 %vm2375_vm0, %v2374_v0 }
 0x419   : > { %v1134_v45 = vpop.f32.mrf.mxu0 }
 0x41a   : > { %v1138_v46 = vmul.f32 0.35355338, %v1134_v45 }
 0x41b   : > { %v1869_v47 = vpop.f32.mrf.mxu0 }
 0x41c   : > { %v1139_v48 = vsel %vm2699_vm3, %v1138_v46, -1000000.0 }
 0x41d   : > { %v1303_v49 = vpop.f32.mrf.mxu0  ;;  %v1140_v50 = vsel %vm726_vm2, %v1139_v48, -inf }
 0x41e   : > { %1141 = vmax.xlane.f32.xlu0 %v1140_v50  ;;  %v1307_v55 = vmul.f32 0.35355338, %v1303_v49 }
 0x41f   : > { %v1879_v51 = vpop.f32.mrf.mxu0 }
 0x420   : > { %v1308_v60 = vsel %vm2699_vm3, %v1307_v55, -1000000.0 }
 0x421   : > { %v1309_v61 = vsel %vm726_vm2, %v1308_v60, -inf }
 0x422   : > { %v2738_v52 = vpop.f32.mrf.mxu1 }
 0x424   : > { %v1854_v53 = vpop.f32.mrf.mxu1 }
 0x426   : > { %v964_v54 = vpop.f32.mrf.mxu1 }
 0x427   : > { %v968_v56 = vmul.f32 0.35355338, %v964_v54 }
 0x428   : > { %v1859_v57 = vpop.f32.mrf.mxu1 }
 0x429   : > { %v969_v58 = vsel %vm2699_vm3, %v968_v56, -1000000.0 }
 0x42a   : > { %v970_v59 = vsel %vm726_vm2, %v969_v58, -inf }
 0x42b   : > { %971 = vmax.xlane.f32.xlu1 %v970_v59 }
 0x42f   : > { %1310 = vmax.xlane.f32.xlu1 %v1309_v61 }
 0x4a7   : > { %v1142_v62 = vpop.xlane.xlu0 %1141 }
 0x4a8   : > { %v1143_v63 = vsub.f32 %v1139_v48, %v1142_v62 }
 0x4aa   : > { %v1144_v1 = vmul.f32 1.442695, %v1143_v63 }
 0x4ac   : > { %2030 = vpow2.f32 %v1144_v1 }
 0x4b4   : > { %v972_v2 = vpop.xlane.xlu1 %971 }
 0x4b5   : > { %v973_v10 = vsub.f32 %v969_v58, %v972_v2 }
 0x4b7   : > { %v974_v11 = vmul.f32 1.442695, %v973_v10 }
 0x4b8   : > { %v1311_v3 = vpop.xlane.xlu1 %1310 }
 0x4b9   : > { %v2031_v4 = vpop.eup %2030  ;;  %v1312_v5 = vsub.f32 %v1308_v60, %v1311_v3 }
 0x4ba   : > { %v1146_v6 = vsel %vm726_vm2, %v2031_v4, 0.0 }
 0x4bb   : > { %v1313_v7 = vmul.f32 1.442695, %v1312_v5  ;;  %1147 = vadd.xlane.f32.xlu0 %v1146_v6 }
 0x4bd   : > { %2032 = vpow2.f32 %v1313_v7 }
 0x4be   : > { %2034 = vpow2.f32 %v974_v11 }
 0x4ca   : > { %v2033_v8 = vpop.eup %2032 }
 0x4cb   : > { %v1315_v9 = vsel %vm726_vm2, %v2033_v8, 0.0  ;;  %v2035_v12 = vpop.eup %2034 }
 0x4cc   : > { %1316 = vadd.xlane.f32.xlu1 %v1315_v9  ;;  %v976_v13 = vsel %vm726_vm2, %v2035_v12, 0.0 }
 0x4d1   : > { %984 = vrot.lane.b32.xlu0 %v2707_v34, %s2376_s17 }
 0x4dd   : > { %1153 = vrot.lane.b32.xlu1 %v2707_v34, %s2377_s24 }
 0x501   : > { %977 = vadd.xlane.f32.xlu1 %v976_v13 }
 0x512   : > { %1322 = vrot.lane.b32.xlu1 %v2707_v34, %s2378_s2 }
 0x544   : > { %v1148_v14 = vpop.xlane.xlu0 %1147 }
 0x545   : > { %2036 = vrcp.f32 %v1148_v14 }
 0x548   : > { %v985_v15 = vpop.permute.xlu0 %984 }
 0x549   : > { %1861 = vmatpush3.msra.mxu1 %v985_v15 }
 0x54a   : > { %1870 = vmatprep.subr.mxu1 %v2374_v0 }
 0x552   : > { %v2037_v16 = vpop.eup %2036 }
 0x553   : > { %v1150_v17 = vmul.f32 %v2037_v16, %v2031_v4 }
 0x555   : > { %v1317_v18 = vpop.xlane.xlu1 %1316  ;;  %1761 = vst.msk [vmem:[%s2723_s4 + $0x10] sm:$0xff] %vm726_vm2, %v1150_v17 }
 0x556   : > { %2038 = vrcp.f32 %v1317_v18 }
 0x559   : > { %v1154_v21 = vpop.permute.xlu1 %1153 }
 0x563   : > { %v2039_v19 = vpop.eup %2038 }
 0x564   : > { %v1319_v20 = vmul.f32 %v2039_v19, %v2033_v8 }
 0x566   : > { %1765 = vst.msk [vmem:[%s2723_s4 + $0x18] sm:$0xff] %vm726_vm2, %v1319_v20 }
 0x58a   : > { %v978_v22 = vpop.xlane.xlu1 %977 }
 0x58b   : > { %2040 = vrcp.f32 %v978_v22 }
 0x58e   : > { %v1323_v25 = vpop.permute.xlu1 %1322 }
 0x598   : > { %v2041_v23 = vpop.eup %2040 }
 0x599   : > { %v980_v24 = vmul.f32 %v2041_v23, %v2035_v12 }
 0x59b   : > { %1757 = vst.msk [vmem:[%s2723_s4 + $0x8] sm:$0xff] %vm726_vm2, %v980_v24  ;;  %1863 = vmatmul.mubr.msk.f32.vlgmr.msra.gmra.mxu1 %vm726_vm2, %v980_v24 }
 0x59c   : > { %1871 = vmatpush3.msra.mxu1 %v1154_v21  ;;  %1872 = vmatprep.mubr.msk.f32.mxu1 %vm2375_vm0, %v2374_v0 }
 0x59d   : > { %1880 = vmatprep.subr.mxu1 %v2374_v0 }
 0x59f   : > { %1873 = vmatmul.mubr.msk.f32.vlgmr.msra.gmra.mxu1 %vm726_vm2, %v1150_v17 }
 0x5a0   : > { %1881 = vmatpush3.msra.mxu1 %v1323_v25  ;;  %1882 = vmatprep.mubr.msk.f32.mxu1 %vm2375_vm0, %v2374_v0 }
 0x5a3   : > { %1883 = vmatmul.mubr.msk.f32.vlgmr.msra.gmra.mxu1 %vm726_vm2, %v1319_v20 }
 0x65b   : > { %v1056_v30 = vpop.f32.mrf.mxu1 }
 0x65c   : > { %1399 = vrot.lane.b32.xlu0 %v1056_v30, %s2379_s29 }
 0x65d   : > { %v1864_v31 = vpop.f32.mrf.mxu1 }
 0x65f   : > { %v1225_v32 = vpop.f32.mrf.mxu1 }
 0x660   : > { %1403 = vrot.lane.b32.xlu1 %v1225_v32, %s2380_s22 }
 0x661   : > { %v1874_v33 = vpop.f32.mrf.mxu1 }
 0x663   : > { %v1394_v34 = vpop.f32.mrf.mxu1 }
 0x664   : > { %1407 = vrot.lane.b32.xlu0 %v1394_v34, %s2381_s6 }
 0x665   : > { %v1884_v35 = vpop.f32.mrf.mxu1 }
 0x6ce   : > { %v1400_v36 = vpop.permute.xlu0 %1399 }
 0x6cf   : > { %v1410_v37 = vsel %vm726_vm2, %v2738_v52, %v1400_v36 }
 0x6d2   : > { %v1404_v0 = vpop.permute.xlu1 %1403 }
 0x6d3   : > { %v1412_v38 = vsel %vm1411_vm4, %v1410_v37, %v1404_v0 }
 0x6d6   : > { %v1408_v39 = vpop.permute.xlu0 %1407 }
 0x6d7   : > { %v1414_v40 = vsel %vm1413_vm5, %v1412_v38, %v1408_v39 }
 0x6d8   : > { %1894 = vmatmul.mubr.msk.f32.vlgmr.msra.gmra.mxu0 %vm493_vm1, %v1414_v40 }
 0x6d9   : > { %2251 = shalt.err (!%p2248_p4)
}
 0x6da   : > { %s2252_s10 = scalar_lea.hbm %s2782_s23, 512  ;;  %s2256_s2 = scalar_lea.hbm %s2872_s8, 1024 }
 0x6db   : > { %p2253_p8 = scmp.ne.s32.totalorder %s2782_s23, %s2252_s10  ;;  %p2257_p0 = scmp.lt.s32.totalorder %s2782_s23, %s2872_s8 }
 0x6dc   : > { %p2258_p13 = scmp.lt.s32.totalorder %s2256_s2, %s2252_s10 }
 0x6dd   : > { %p2254_p6 = pnand %p2253_p8, %p2923_p12 }
 0x6de   : > { %p2259_p9 = por %p2258_p13, %p2257_p0 }
 0x6df   : > { %p2255_p3 = pneg %p2254_p6 }
 0x6e1   : > { %p2260_p11 = pnand %p2259_p9, %p2255_p3 }
 0x6e3   : > { %2263 = shalt.err (!%p2260_p11)
}
 0x6e4   : > { %s2383_s4 = smov 128   ;;  %s1772_s22 = sshll.u32 %s2354_s0, 7 }
 0x6e5   : > { %1918 = dma.vmem_to_hbm [thread:$0]  (%p2923_p12), %s2784_s19, 512, %s2782_s23, %s1494_s25, %s2383_s4, %s2383_s4, %s2379_s29  }
 0x6e6   : > { %s484_s6 = scalar_lea.vmem [#allocation17], %s2632_s28  ;;  %s2815_s30 = scalar_lea.hbm %s2873_s9, %s1772_s22 }
 0x6e7   : > { %s1530_s26 = sshll.u32 %s484_s6, 4  ;;  %s1499_s5 = scalar_lea.sflag [#allocation18], %s2629_s11  ;;  %s2817_s26 = int_to_ptr.vmem [resolvable:$true] %s1530_s26 }
 0x6e8   : > { %s2264_s15 = scalar_lea.vmem %s2817_s26, 128  ;;  %s2384_s0 = smov [#allocation17]  }
 0x6e9   : > { %p2265_p2 = scmp.ne.s32.totalorder %s2817_s26, %s2264_s15  ;;  %s2268_s28 = sshll.u32 %s2384_s0, 4  ;;  %s2269_s28 = int_to_ptr.vmem [resolvable:$false] %s2268_s28 }
 0x6ea   : > { %s2270_s29 = scalar_lea.vmem %s2269_s28, 256  ;;  %p2271_p1 = scmp.lt.s32.totalorder %s2817_s26, %s2269_s28 }
 0x6eb   : > { %p2266_p5 = pnand %p2265_p2, %p2923_p12  ;;  %p2272_p7 = scmp.lt.s32.totalorder %s2270_s29, %s2264_s15 }
 0x6ed   : > { %p2267_p10 = pneg %p2266_p5  ;;  %p2273_p4 = por %p2272_p7, %p2271_p1 }
 0x6ef   : > { %p2274_p8 = pnand %p2273_p4, %p2267_p10 }
 0x798   : > { %v1488_v41 = vpop.f32.mrf.mxu0 }
 0x799   : > { %1492 = vst.msk [vmem:[%s484_s6] sm:$0xff] %vm493_vm1, %v1488_v41 }
 0x79a   : > { %v1895_v42 = vpop.f32.mrf.mxu0 }
 0x79b   : > { %2277 = shalt.err (!%p2274_p8)
}
 0x79c   : > { %s2278_s19 = scalar_lea.hbm %s2815_s30, 128  ;;  %s2282_s25 = scalar_lea.hbm %s2873_s9, 256 }
 0x79d   : > { %p2279_p6 = scmp.ne.s32.totalorder %s2815_s30, %s2278_s19  ;;  %p2283_p13 = scmp.lt.s32.totalorder %s2815_s30, %s2873_s9 }
 0x79e   : > { %p2284_p9 = scmp.lt.s32.totalorder %s2282_s25, %s2278_s19 }
 0x79f   : > { %p2280_p3 = pnand %p2279_p6, %p2923_p12 }
 0x7a0   : > { %p2285_p11 = por %p2284_p9, %p2283_p13 }
 0x7a1   : > { %p2281_p0 = pneg %p2280_p3 }
 0x7a3   : > { %p2286_p2 = pnand %p2285_p11, %p2281_p0 }
 0x7a5   : > { %2289 = shalt.err (!%p2286_p2)
}
 0x7a6   : > { %1919 = dma.vmem_to_hbm [thread:$0]  (%p2923_p12), %s2817_s26, 128, %s2815_s30, %s1499_s5  }
 0x7a7 PF: > { %s2924_s17 = sld [smem:[#allocation26_spill]] }
 0x7a8   : > { %s2925_s24 = sld [smem:[#allocation31_spill]] }
 0x7a9   : > { %s2926_s2 = sld [smem:[#allocation28_spill]] }
 0x7ad   : > { %s1542_s20 = sand.u32 1, %s2924_s17  }
 0x7ae   : > { %p2927_p5 = scmp.ne.s32.totalorder %s2925_s24, 0  ;;  %s1543_s16 = scalar_lea.sflag [#allocation6], %s1542_s20 }
 0x7af   : > { %p2928_p10 = scmp.ge.s32.totalorder %s2926_s2, 2 }
 0x7b1   : > { %p1946_p1 = pnand %p2928_p10, %p2927_p5 }
 0x7b3   : > { %p1947_p7 = pneg %p1946_p1 }
 0x7b5   : > { %2333 = dma.done.wait (%p1947_p7), %s1543_s16, 512  }
 0x7b6   : > { %2335 = vsyncadd (%p1947_p7), %s1543_s16, 4294966784  ;;  %s1552_s4 = scalar_lea.sflag [#allocation18], %s1542_s20 }
 0x7b7   : > { %2337 = dma.done.wait (%p1947_p7), %s1552_s4, 128  }
 0x7b8   : > { %2339 = vsyncadd (%p1947_p7), %s1552_s4, 4294967168  ;;  %s38_s16 = sadd.s32 1, %s2926_s2   ;;  %s2929_s27 = sld [smem:[#allocation30_spill]] }
 0x7b9   : > { %p35_p4 = scmp.ge.s32.totalorder %s38_s16, 4   ;;  %s2930_s0 = sld [smem:[#allocation27_spill]] }
 0x7ba   : > { %s2931_s15 = sld [smem:[#allocation29_spill]]  ;;  %s2932_s12 = smov %s2346_s13 }
 0x7bb   : > { %s2933_s13 = smov %s2350_s14  ;;  %37 = sbr.rel (!%p35_p4) target bundleno = 21 (0x15), region = 153 }
 0x7be   : > { %s2934_s14 = smov %s2929_s27 }
 0x7c0   :  { %1557 = vsyncpa [#allocation5], 1 }
 0x7c1   :  { %1559 = vsyncpa [#allocation5 + $0x1], 1 }
 0x7c2   :  { %1560 = vsyncpa [#allocation8], 1 }
 0x7c3   :  { %1562 = vsyncpa [#allocation8 + $0x1], 1 }
 0x7c4   :  { %1563 = vsyncpa [#allocation11], 1 }
 0x7c5   :  { %1564 = vsyncpa [#allocation14], 1 }
 0x7c6   :  { %1565 = vsyncpa [#allocation6], 1 }
 0x7c7   :  { %1567 = vsyncpa [#allocation6 + $0x1], 1 }
 0x7c8   :  { %1568 = vsyncpa [#allocation18], 1 }
 0x7c9   :  { %1570 = vsyncpa [#allocation18 + $0x1], 1 }

</bundles_post_ra>
